<compile_context>
chip_gen: v7x
topology: tpu7x:2x2x1
jax: 0.10.0
libtpu: 0.0.40
codegen_flags: <defaults>
</compile_context>

<pallas_src>
import functools

import jax
import jax.numpy as jnp
from jax.experimental import pallas as pl
from jax.experimental.pallas import tpu as pltpu


def _round_up(x: int, m: int) -> int:
    return ((x + m - 1) // m) * m


def classify_header5_kernel(nlpl_ref, w1_ref, w2_ref, bias_ref, out_ref, *, hidden):
    """Fused classifyHeader5 forward for one batch tile.

    nlpl_ref : (TB, 2H)        packed [nl | pl] activations
    w1_ref   : (3H, H2_pad)    W_dense^T, output dim zero-padded to 128 multiple
    w2_ref   : (H2_pad, 128)   W_out^T, zero-padded (rows >=2H and cols >=2 are 0)
    bias_ref : (2, 128)        row 0 = dense bias (padded), row 1 = output bias (padded)
    out_ref  : (TB, 128)       padded logits (first 2 lanes are real)
    """
    h = hidden
    nlpl = nlpl_ref[...]                                   # (TB, 2H)
    nl = nlpl[:, :h]
    plh = nlpl[:, h:]
    diff = jnp.abs(nl - plh)                               # (TB, H)

    # fuse = cat([diff, nl, pl], -1) built in-kernel (nlpl is already [nl|pl]).
    fuse_in = jnp.concatenate([diff, nlpl], axis=-1)       # (TB, 3H)

    bias = bias_ref[...]                                   # (2, 128)
    b1 = bias[0:1, : w1_ref.shape[1]]
    b2 = bias[1:2, : out_ref.shape[1]]

    # Single dense GEMM, f32 accumulation on the MXU.
    fuse = (
        jnp.dot(fuse_in.astype(w1_ref.dtype), w1_ref[...],
                preferred_element_type=jnp.float32)
        + b1
    )                                                      # (TB, H2_pad)

    s = jax.nn.sigmoid(fuse)                               # EUP pass
    # TODO(synk): nn.Dropout(0.2) is identity at inference; training-mode dropout
    # would use pltpu.prng_seed + pltpu.stateful_bernoulli here.

    logits = (
        jnp.dot(s.astype(w2_ref.dtype), w2_ref[...],
                preferred_element_type=jnp.float32)
        + b2
    )                                                      # (TB, 128) lane-dense
    out_ref[...] = logits.astype(out_ref.dtype)


def prepare_classify_header5_params(w_dense, b_dense, w_out, b_out,
                                    compute_dtype=jnp.float32):
    """Repack PyTorch-layout weights ONCE at model load.

    w_dense : (2H, 3H)  nn.Linear(3H, 2H).weight  (out, in)
    b_dense : (2H,)
    w_out   : (2, 2H)   nn.Linear(2H, 2).weight
    b_out   : (2,)
    """
    h2, h3 = w_dense.shape
    n_out = w_out.shape[0]
    assert h3 % 3 == 0
    hidden = h3 // 3
    h2_pad = _round_up(h2, 128)          # lane-dense dense-layer output width
    n_pad = 128                          # lane-dense logits width
    bias_w = max(h2_pad, n_pad)

    # W1^T, zero-padded output columns. Padded lanes: 0 + 0 bias -> sigmoid=0.5,
    # which is annihilated by the zero rows of the padded W2^T below.
    w1 = jnp.zeros((h3, h2_pad), compute_dtype)
    w1 = w1.at[:, :h2].set(jnp.transpose(w_dense).astype(compute_dtype))

    w2 = jnp.zeros((h2_pad, n_pad), compute_dtype)
    w2 = w2.at[:h2, :n_out].set(jnp.transpose(w_out).astype(compute_dtype))

    bias = jnp.zeros((2, bias_w), jnp.float32)
    bias = bias.at[0, :h2].set(b_dense.astype(jnp.float32))
    bias = bias.at[1, :n_out].set(b_out.astype(jnp.float32))

    return dict(w1=w1, w2=w2, bias=bias, hidden=hidden,
                h2_pad=h2_pad, n_pad=n_pad, n_out=n_out)


def classify_header5_forward(nl_hidden, pl_hidden, params):
    """classifyHeader5.forward using pre-packed params. Returns (B, 2) logits."""
    B, H = nl_hidden.shape
    assert params["hidden"] == H
    w1, w2, bias = params["w1"], params["w2"], params["bias"]
    h3, h2_pad = w1.shape
    n_pad = params["n_pad"]

    # Pack activations into a single operand [nl | pl] (one DMA instead of two).
    nlpl = jnp.concatenate([nl_hidden, pl_hidden], axis=1)      # (B, 2H)

    # Batch tiling: pad B to a multiple of 8 (sublane-dense stores); tile at
    # <=512 rows so big batches pipeline and shard across v7x's 2 TCs.
    if B <= 512:
        tb = _round_up(B, 8)
        b_pad = tb
    else:
        tb = 512
        b_pad = _round_up(B, tb)
    if b_pad != B:
        nlpl = jnp.pad(nlpl, ((0, b_pad - B), (0, 0)))
    grid = (b_pad // tb,)

    out_dtype = nl_hidden.dtype
    esize = jnp.dtype(out_dtype).itemsize
    cost = pl.CostEstimate(
        flops=2 * b_pad * (h3 * h2_pad + h2_pad * n_pad),
        transcendentals=b_pad * h2_pad,
        bytes_accessed=(nlpl.size * nlpl.dtype.itemsize
                        + w1.size * w1.dtype.itemsize
                        + w2.size * w2.dtype.itemsize
                        + bias.size * bias.dtype.itemsize
                        + b_pad * n_pad * esize),
    )

    kernel = functools.partial(classify_header5_kernel, hidden=H)
    out_padded = pl.pallas_call(
        kernel,
        out_shape=jax.ShapeDtypeStruct((b_pad, n_pad), out_dtype),
        grid=grid,
        in_specs=[
            pl.BlockSpec((tb, 2 * H), lambda i: (i, 0)),          # activations: tiled
            pl.BlockSpec((h3, h2_pad), lambda i: (0, 0)),         # weights: VMEM-resident
            pl.BlockSpec(w2.shape, lambda i: (0, 0)),
            pl.BlockSpec(bias.shape, lambda i: (0, 0)),
        ],
        out_specs=pl.BlockSpec((tb, n_pad), lambda i: (i, 0)),
        compiler_params=pltpu.CompilerParams(
            dimension_semantics=("parallel",),
            vmem_limit_bytes=32 * 1024 * 1024,
        ),
        cost_estimate=cost,
    )(nlpl, w1, w2, bias)

    return out_padded[:B, :params["n_out"]]


def _reference(nl_hidden, pl_hidden, w_dense, b_dense, w_out, b_out):
    """Pure-JAX reference mirroring the PyTorch forward (inference mode)."""
    concated = jnp.concatenate([nl_hidden, pl_hidden], axis=1)
    diff = jnp.abs(nl_hidden - pl_hidden)
    fuse = jnp.concatenate([diff, concated], axis=1)
    fuse = fuse @ w_dense.T + b_dense
    s = jax.nn.sigmoid(fuse)
    return s @ w_out.T + b_out


if __name__ == "__main__":
    # Small deterministic shapes consistent with the module:
    #   batch B=2, hidden_size H=32, rnn_type='lstm' -> bi=1
    B, H = 2, 32
    H3, H2 = 3 * H, 2 * H

    key = jax.random.PRNGKey(0)
    k_nl, k_pl, k_w1, k_b1, k_w2, k_b2 = jax.random.split(key, 6)

    nl_hidden = jax.random.normal(k_nl, (B, H), dtype=jnp.float32)
    pl_hidden = jax.random.normal(k_pl, (B, H), dtype=jnp.float32)

    # PyTorch-default-like uniform init: U(-1/sqrt(fan_in), 1/sqrt(fan_in))
    bound1 = 1.0 / jnp.sqrt(jnp.float32(H3))
    bound2 = 1.0 / jnp.sqrt(jnp.float32(H2))
    w_dense = jax.random.uniform(k_w1, (H2, H3), minval=-bound1, maxval=bound1,
                                 dtype=jnp.float32)
    b_dense = jax.random.uniform(k_b1, (H2,), minval=-bound1, maxval=bound1,
                                 dtype=jnp.float32)
    w_out = jax.random.uniform(k_w2, (2, H2), minval=-bound2, maxval=bound2,
                               dtype=jnp.float32)
    b_out = jax.random.uniform(k_b2, (2,), minval=-bound2, maxval=bound2,
                               dtype=jnp.float32)

    # Weight packing happens once, outside the forward path.
    params = prepare_classify_header5_params(w_dense, b_dense, w_out, b_out)

    logits = classify_header5_forward(nl_hidden, pl_hidden, params)
    logits = jax.block_until_ready(logits)

    assert logits.shape == (B, 2) and logits.dtype == jnp.float32

    ref = _reference(nl_hidden, pl_hidden, w_dense, b_dense, w_out, b_out)
    assert jnp.allclose(logits, ref, atol=1e-4, rtol=1e-4), (logits, ref)

    print("KERNEL_OK")
</pallas_src>

<mosaic_0001>
module attributes {stable_mosaic.version = 11 : i64} {
  func.func @classify_header5_kernel(%arg0: i32, %arg1: memref<8x64xf32, #tpu.memory_space<vmem>>, %arg2: memref<96x128xf32, #tpu.memory_space<vmem>>, %arg3: memref<128x128xf32, #tpu.memory_space<vmem>>, %arg4: memref<2x128xf32, #tpu.memory_space<vmem>>, %arg5: memref<8x128xf32, #tpu.memory_space<vmem>>) attributes {dimension_semantics = [#tpu.dimension_semantics<parallel>], iteration_bounds = array<i64: 1>, scalar_prefetch = 0 : i64, scratch_operands = 0 : i64, tpu.core_type = #tpu.core_type<tc>, window_params = [{transform_indices = @transform_0, window_bounds = array<i64: 8, 64>}, {pipeline_mode = #tpu.pipeline_mode<synchronous>, transform_indices = @transform_1, window_bounds = array<i64: 96, 128>}, {pipeline_mode = #tpu.pipeline_mode<synchronous>, transform_indices = @transform_2, window_bounds = array<i64: 128, 128>}, {pipeline_mode = #tpu.pipeline_mode<synchronous>, transform_indices = @transform_3, window_bounds = array<i64: 2, 128>}, {transform_indices = @transform_4, window_bounds = array<i64: 8, 128>}]} {
    %c0 = arith.constant 0 : index
    %c0_0 = arith.constant 0 : index
    %0 = vector.load %arg1[%c0, %c0_0] : memref<8x64xf32, #tpu.memory_space<vmem>>, vector<8x64xf32>
    %1 = vector.extract_strided_slice %0 {offsets = [0, 0], sizes = [8, 32], strides = [1, 1]} : vector<8x64xf32> to vector<8x32xf32>
    %2 = vector.extract_strided_slice %0 {offsets = [0, 32], sizes = [8, 32], strides = [1, 1]} : vector<8x64xf32> to vector<8x32xf32>
    %3 = arith.subf %1, %2 : vector<8x32xf32>
    %4 = math.absf %3 : vector<8x32xf32>
    %5 = tpu.concatenate %4, %0 in 1 : vector<8x32xf32>, vector<8x64xf32> -> vector<8x96xf32>
    %c0_1 = arith.constant 0 : index
    %c0_2 = arith.constant 0 : index
    %6 = vector.load %arg4[%c0_1, %c0_2] : memref<2x128xf32, #tpu.memory_space<vmem>>, vector<2x128xf32>
    %7 = vector.extract_strided_slice %6 {offsets = [0, 0], sizes = [1, 128], strides = [1, 1]} : vector<2x128xf32> to vector<1x128xf32>
    %8 = vector.extract_strided_slice %6 {offsets = [1, 0], sizes = [1, 128], strides = [1, 1]} : vector<2x128xf32> to vector<1x128xf32>
    %c0_3 = arith.constant 0 : index
    %c0_4 = arith.constant 0 : index
    %9 = vector.load %arg2[%c0_3, %c0_4] : memref<96x128xf32, #tpu.memory_space<vmem>>, vector<96x128xf32>
    %cst = arith.constant dense<0.000000e+00> : vector<8x128xf32>
    %10 = tpu.matmul %5, %9, %cst {dimension_numbers = #tpu.dot_dimension_numbers<[1], [0], [0], [1], [0, 0, 1, 1], [], []>} : vector<8x96xf32>, vector<96x128xf32>, vector<8x128xf32> -> vector<8x128xf32>
    %11 = vector.broadcast %7 : vector<1x128xf32> to vector<8x128xf32>
    %12 = arith.addf %10, %11 : vector<8x128xf32>
    %13 = arith.negf %12 : vector<8x128xf32>
    %14 = math.exp %13 : vector<8x128xf32>
    %cst_5 = arith.constant 1.000000e+00 : f32
    %15 = vector.broadcast %cst_5 : f32 to vector<8x128xf32>
    %16 = arith.addf %15, %14 : vector<8x128xf32>
    %17 = arith.divf %15, %16 : vector<8x128xf32>
    %c0_6 = arith.constant 0 : index
    %c0_7 = arith.constant 0 : index
    %18 = vector.load %arg3[%c0_6, %c0_7] : memref<128x128xf32, #tpu.memory_space<vmem>>, vector<128x128xf32>
    %cst_8 = arith.constant dense<0.000000e+00> : vector<8x128xf32>
    %19 = tpu.matmul %17, %18, %cst_8 {dimension_numbers = #tpu.dot_dimension_numbers<[1], [0], [0], [1], [0, 0, 1, 1], [], []>} : vector<8x128xf32>, vector<128x128xf32>, vector<8x128xf32> -> vector<8x128xf32>
    %20 = vector.broadcast %8 : vector<1x128xf32> to vector<8x128xf32>
    %21 = arith.addf %19, %20 : vector<8x128xf32>
    %c0_9 = arith.constant 0 : index
    %c0_10 = arith.constant 0 : index
    %22 = vector.load %arg5[%c0_9, %c0_10] : memref<8x128xf32, #tpu.memory_space<vmem>>, vector<8x128xf32>
    tpu.vector_store %arg5[%c0_9, %c0_10], %21 {strides = array<i32>} : memref<8x128xf32, #tpu.memory_space<vmem>>, vector<8x128xf32>,
    return
  }
  func.func @transform_0(%arg0: i32) -> (i32, i32) {
    %c0_i32 = arith.constant 0 : i32
    %c0_i32_0 = arith.constant 0 : i32
    return %arg0, %c0_i32 : i32, i32
  }
  func.func @transform_1(%arg0: i32) -> (i32, i32) {
    %c0_i32 = arith.constant 0 : i32
    %c0_i32_0 = arith.constant 0 : i32
    %c0_i32_1 = arith.constant 0 : i32
    return %c0_i32, %c0_i32_0 : i32, i32
  }
  func.func @transform_2(%arg0: i32) -> (i32, i32) {
    %c0_i32 = arith.constant 0 : i32
    %c0_i32_0 = arith.constant 0 : i32
    %c0_i32_1 = arith.constant 0 : i32
    return %c0_i32, %c0_i32_0 : i32, i32
  }
  func.func @transform_3(%arg0: i32) -> (i32, i32) {
    %c0_i32 = arith.constant 0 : i32
    %c0_i32_0 = arith.constant 0 : i32
    %c0_i32_1 = arith.constant 0 : i32
    return %c0_i32, %c0_i32_0 : i32, i32
  }
  func.func @transform_4(%arg0: i32) -> (i32, i32) {
    %c0_i32 = arith.constant 0 : i32
    %c0_i32_0 = arith.constant 0 : i32
    return %arg0, %c0_i32 : i32, i32
  }
}

</mosaic_0001>

<bundles_post_ra>
// kernel: tpu_custom_call.1
= control target key start
LH: loop header
LB: loop body
LE: loop exit
PB: predicated region body
PF: predicated region fallthrough
CT: control target
= control target key end

     0   :  { %9 = vsyncpa [#allocation3], 0  ;;  %s625_s0 = inlined_call_operand.hbm [shape: f32[8,64], index: 0, kind: input, shape index: {}]   ;;  %s626_s1 = inlined_call_operand.hbm [shape: f32[96,128], index: 1, kind: input, shape index: {}]   ;;  %s627_s2 = inlined_call_operand.hbm [shape: f32[128,128], index: 2, kind: input, shape index: {}]   ;;  %s628_s3 = inlined_call_operand.vmem [shape: f32[2,128], index: 3, kind: input, shape index: {}]   ;;  %s629_s4 = inlined_call_operand.hbm [shape: f32[8,128], index: 4, kind: output, shape index: {}]  }
   0x1   :  { %10 = vsyncpa [#allocation6], 0 }
   0x2   :  { %11 = vsyncpa [#allocation4], 0  ;;  %s518_s15 = smov [#allocation5]   ;;  %s424_s19 = scalar_lea.hbm %s626_s1, 1536 }
   0x3   :  { %s27_s16 = sshll.u32 %s518_s15, 4  ;;  %p425_p0 = scmp.ne.s32.totalorder %s626_s1, %s424_s19  ;;  %s28_s16 = int_to_ptr.vmem [resolvable:$true] %s27_s16 }
   0x4   :  { %p428_p1 = scmp.lt.u32.totalorder %s424_s19, %s626_s1 }
   0x6   :  { %p430_p2 = pnand %p428_p1, %p425_p0 }
   0x8   :  { %433 = shalt.err (!%p430_p2)
}
   0x9   :  { %s434_s24 = scalar_lea.vmem %s28_s16, 1536  ;;  %p439_p4 = scmp.lt.s32.totalorder %s28_s16, %s28_s16 }
   0xa   :  { %p435_p3 = scmp.ne.s32.totalorder %s28_s16, %s434_s24  ;;  %p440_p5 = scmp.lt.s32.totalorder %s434_s24, %s434_s24 }
   0xc   :  { %p441_p6 = por %p440_p5, %p439_p4 }
   0xe   :  { %p442_p7 = pnand %p441_p6, %p435_p3 }
  0x10   :  { %445 = shalt.err (!%p442_p7)
}
  0x11   :  { %s519_s25 = smov 128   ;;  %s520_s26 = smov 8  }
  0x12   :  { %33 = dma.hbm_to_vmem [thread:$0]  %s626_s1, 1536, %s28_s16, [#allocation6], %s519_s25, %s519_s25, %s520_s26  }
  0x13   :  { %s521_s29 = smov [#allocation2]   ;;  %s522_s5 = smov [#allocation7]  }
  0x14   :  { %s18_s30 = sshll.u32 %s521_s29, 4  ;;  %s39_s6 = sshll.u32 %s522_s5, 4  ;;  %s19_s30 = int_to_ptr.vmem [resolvable:$true] %s18_s30  ;;  %s40_s6 = int_to_ptr.vmem [resolvable:$true] %s39_s6 }
  0x15   :  { %s446_s9 = scalar_lea.hbm %s625_s0, 128 }
  0x16   :  { %p447_p8 = scmp.ne.s32.totalorder %s625_s0, %s446_s9  ;;  %p450_p9 = scmp.lt.u32.totalorder %s446_s9, %s625_s0 }
  0x18   :  { %p452_p10 = pnand %p450_p9, %p447_p8 }
  0x1a   :  { %455 = shalt.err (!%p452_p10)
}
  0x1b   :  { %s456_s1 = scalar_lea.vmem %s19_s30, 128  ;;  %p461_p12 = scmp.lt.s32.totalorder %s19_s30, %s19_s30 }
  0x1c   :  { %p457_p11 = scmp.ne.s32.totalorder %s19_s30, %s456_s1  ;;  %p462_p13 = scmp.lt.s32.totalorder %s456_s1, %s456_s1 }
  0x1e   :  { %p463_p0 = por %p462_p13, %p461_p12 }
  0x20   :  { %p464_p1 = pnand %p463_p0, %p457_p11 }
  0x22   :  { %467 = shalt.err (!%p464_p1)
}
  0x23   :  { %21 = dma.hbm_to_vmem [thread:$0]  %s625_s0, 128, %s19_s30, [#allocation3]  }
  0x24   :  { %s468_s18 = scalar_lea.hbm %s627_s2, 2048 }
  0x25   :  { %p469_p2 = scmp.ne.s32.totalorder %s627_s2, %s468_s18  ;;  %p472_p3 = scmp.lt.u32.totalorder %s468_s18, %s627_s2 }
  0x27   :  { %p474_p4 = pnand %p472_p3, %p469_p2 }
  0x29   :  { %477 = shalt.err (!%p474_p4)
}
  0x2a   :  { %s478_s23 = scalar_lea.vmem %s40_s6, 2048  ;;  %p483_p6 = scmp.lt.s32.totalorder %s40_s6, %s40_s6 }
  0x2b   :  { %p479_p5 = scmp.ne.s32.totalorder %s40_s6, %s478_s23  ;;  %p484_p7 = scmp.lt.s32.totalorder %s478_s23, %s478_s23 }
  0x2d   :  { %p485_p8 = por %p484_p7, %p483_p6 }
  0x2f   :  { %p486_p9 = pnand %p485_p8, %p479_p5 }
  0x31   :  { %489 = shalt.err (!%p486_p9)
}
  0x32   :  { %45 = dma.hbm_to_vmem [thread:$0]  %s627_s2, 2048, %s40_s6, [#allocation6], %s519_s25, %s519_s25, %s520_s26  }
  0x33   :  { %512 = dma.done.wait [#allocation3], 128  }
  0x34   :  { %513 = vsyncadd [#allocation3], 4294967168 }
  0x35   :  { %514 = dma.done.wait [#allocation6], 3584  }
  0x36   :  { %515 = vsyncadd [#allocation6], 4294963712  ;;  %v523_v0 = vmov 0.0|0.0   ;;  %vm524_vm0 = vmmov 0   ;;  %v525_v1 = vmov 0.0   ;;  %v57_v2 = vld [vmem:[#allocation2] sm:$0xff]  ;;  %v82_v50 = vlaneseq }
  0x37   :  { %367 = vmatprep.subr.bf16.mxu0 %v523_v0  ;;  %385 = vmatprep.subr.bf16.mxu1 %v523_v0  ;;  %v70_v3 = vld [vmem:[#allocation5] sm:$0xff]  ;;  %v71_v4 = vld [vmem:[#allocation5 + $0x8] sm:$0xff]  ;;  %s526_s27 = smov 96   ;;  %v72_v6 = vld [vmem:[#allocation5 + $0x10] sm:$0xff]  ;;  %s527_s2 = smov 32   ;;  %vm67_vm1 = vcmask 261120  }
  0x38   :  { %329 = vmatprep.mubr.msk.f32.mxu0 %vm524_vm0, %v525_v1  ;;  %364 = vmatprep.mubr.msk.f32.mxu1 %vm524_vm0, %v525_v1  ;;  %v368_v5 = vpack.c.bf16 %v71_v4, %v70_v3  ;;  %v73_v7 = vld [vmem:[#allocation5 + $0x18] sm:$0xff]  ;;  %v74_v9 = vld [vmem:[#allocation5 + $0x20] sm:$0xff]  ;;  %v75_v10 = vld [vmem:[#allocation5 + $0x28] sm:$0xff]  ;;  %vm86_vm2 = vcmask 785408   ;;  %v83_v51 = vshrl.u32 %v82_v50, 7  ;;  %s528_s28 = smov [#allocation8]  }
  0x39   :  { %59 = vrot.lane.b32.xlu0 %v57_v2, %s526_s27  ;;  %v371_v8 = vpack.c.bf16 %v73_v7, %v72_v6  ;;  %v166_v11 = vld [vmem:[#allocation7] sm:$0xff]  ;;  %v167_v12 = vld [vmem:[#allocation7 + $0x8] sm:$0xff]  ;;  %v374_v14 = vpack.c.bf16 %v75_v10, %v74_v9  ;;  %v76_v15 = vld [vmem:[#allocation5 + $0x30] sm:$0xff]  ;;  %s263_s29 = sshll.u32 %s528_s28, 4  ;;  %s264_s29 = int_to_ptr.vmem [resolvable:$true] %s263_s29 }
  0x3a   :  { %369 = vmatpush3.bf16.msra.mxu0 %v368_v5  ;;  %v386_v13 = vpack.c.bf16 %v167_v12, %v166_v11  ;;  %v77_v16 = vld [vmem:[#allocation5 + $0x38] sm:$0xff]  ;;  %v78_v18 = vld [vmem:[#allocation5 + $0x40] sm:$0xff]  ;;  %v79_v19 = vld [vmem:[#allocation5 + $0x48] sm:$0xff]  ;;  %v84_v52 = vsub.s32 0, %v83_v51  ;;  %v184_v62 = vsub.s32 1, %v83_v51  ;;  %p495_p11 = scmp.lt.s32.totalorder %s264_s29, %s264_s29 }
  0x3b   :  { %370 = vmatprep.subr.bf16.mxu0 %v523_v0  ;;  %v377_v17 = vpack.c.bf16 %v77_v16, %v76_v15  ;;  %v380_v20 = vpack.c.bf16 %v79_v19, %v78_v18  ;;  %v80_v21 = vld [vmem:[#allocation5 + $0x50] sm:$0xff]  ;;  %v81_v22 = vld [vmem:[#allocation5 + $0x58] sm:$0xff]  ;;  %v170_v32 = vld [vmem:[#allocation7 + $0x20] sm:$0xff] }
  0x3c   :  { %387 = vmatpush3.bf16.msra.mxu1 %v386_v13  ;;  %v383_v23 = vpack.c.bf16 %v81_v22, %v80_v21  ;;  %v168_v29 = vld [vmem:[#allocation7 + $0x10] sm:$0xff]  ;;  %v169_v30 = vld [vmem:[#allocation7 + $0x18] sm:$0xff]  ;;  %v171_v33 = vld [vmem:[#allocation7 + $0x28] sm:$0xff] }
  0x3d   :  { %64 = vrot.lane.b32.xlu0 %v57_v2, %s527_s2  ;;  %388 = vmatprep.subr.bf16.mxu1 %v523_v0  ;;  %v389_v31 = vpack.c.bf16 %v169_v30, %v168_v29  ;;  %v392_v34 = vpack.c.bf16 %v171_v33, %v170_v32  ;;  %v172_v35 = vld [vmem:[#allocation7 + $0x30] sm:$0xff]  ;;  %v173_v36 = vld [vmem:[#allocation7 + $0x38] sm:$0xff]  ;;  %v174_v38 = vld [vmem:[#allocation7 + $0x40] sm:$0xff] }
  0x3e   :  { %372 = vmatpush3.bf16.msra.mxu0 %v371_v8  ;;  %v395_v37 = vpack.c.bf16 %v173_v36, %v172_v35  ;;  %v175_v39 = vld [vmem:[#allocation7 + $0x48] sm:$0xff]  ;;  %v176_v41 = vld [vmem:[#allocation7 + $0x50] sm:$0xff]  ;;  %v177_v42 = vld [vmem:[#allocation7 + $0x58] sm:$0xff] }
  0x3f   :  { %373 = vmatprep.subr.bf16.mxu0 %v523_v0  ;;  %v398_v40 = vpack.c.bf16 %v175_v39, %v174_v38  ;;  %v401_v43 = vpack.c.bf16 %v177_v42, %v176_v41  ;;  %v178_v44 = vld [vmem:[#allocation7 + $0x60] sm:$0xff]  ;;  %v179_v45 = vld [vmem:[#allocation7 + $0x68] sm:$0xff]  ;;  %v180_v47 = vld [vmem:[#allocation7 + $0x70] sm:$0xff] }
  0x40   :  { %390 = vmatpush3.bf16.msra.mxu1 %v389_v31  ;;  %v404_v46 = vpack.c.bf16 %v179_v45, %v178_v44  ;;  %v181_v48 = vld [vmem:[#allocation7 + $0x78] sm:$0xff] }
  0x41   :  { %391 = vmatprep.subr.bf16.mxu1 %v523_v0  ;;  %v407_v49 = vpack.c.bf16 %v181_v48, %v180_v47  ;;  %v69_v53 = vld [vmem:[%s628_s3] sm:$0x3]  ;;  %s490_s3 = scalar_lea.vmem %s264_s29, 128 }
  0x42   :  { %375 = vmatpush3.bf16.msra.mxu0 %v374_v14  ;;  %v85_v54 = vrot.slane %v69_v53, %v84_v52  ;;  %v185_v63 = vrot.slane %v69_v53, %v184_v62  ;;  %p491_p10 = scmp.ne.s32.totalorder %s264_s29, %s490_s3  ;;  %p496_p12 = scmp.lt.s32.totalorder %s490_s3, %s490_s3 }
  0x43   :  { %376 = vmatprep.subr.bf16.mxu0 %v523_v0 }
  0x44   :  { %393 = vmatpush3.bf16.msra.mxu1 %v392_v34  ;;  %p497_p13 = por %p496_p12, %p495_p11 }
  0x45   :  { %394 = vmatprep.subr.bf16.mxu1 %v523_v0 }
  0x46   :  { %378 = vmatpush3.bf16.msra.mxu0 %v377_v17  ;;  %p498_p0 = pnand %p497_p13, %p491_p10 }
  0x47   :  { %379 = vmatprep.subr.bf16.mxu0 %v523_v0 }
  0x48   :  { %396 = vmatpush3.bf16.msra.mxu1 %v395_v37 }
  0x49   :  { %397 = vmatprep.subr.bf16.mxu1 %v523_v0 }
  0x4a   :  { %381 = vmatpush3.bf16.msra.mxu0 %v380_v20 }
  0x4b   :  { %382 = vmatprep.subr.bf16.mxu0 %v523_v0 }
  0x4c   :  { %399 = vmatpush3.bf16.msra.mxu1 %v398_v40 }
  0x4d   :  { %400 = vmatprep.subr.bf16.mxu1 %v523_v0 }
  0x4e   :  { %384 = vmatpush3.bf16.msra.mxu0 %v383_v23 }
  0x50   :  { %402 = vmatpush3.bf16.msra.mxu1 %v401_v43 }
  0x51   :  { %403 = vmatprep.subr.bf16.mxu1 %v523_v0 }
  0x54   :  { %405 = vmatpush3.bf16.msra.mxu1 %v404_v46 }
  0x55   :  { %406 = vmatprep.subr.bf16.mxu1 %v523_v0 }
  0x58   :  { %408 = vmatpush3.bf16.msra.mxu1 %v407_v49 }
  0xab   :  { %v60_v24 = vpop.permute.xlu0 %59 }
  0xac   :  { %v62_v25 = vsub.f32 %v57_v2, %v60_v24 }
  0xae   :  { %v63_v26 = vand.u32 2147483647, %v62_v25 }
  0xaf   :  { %v65_v27 = vpop.permute.xlu0 %64 }
  0xb0   :  { %v68_v28 = vsel %vm67_vm1, %v63_v26, %v65_v27 }
  0xb1   :  { %330 = vmatmul.mubr.msk.f32.vlgmr.msra.gmra.mrb[0].mxu0 %vm86_vm2, %v68_v28 }
 0x184   :  { %v156_v55 = vpop.f32.mrb[0].mxu0 }
 0x185   :  { %v157_v56 = vadd.f32 %v156_v55, %v85_v54  ;;  %v331_v57 = vpop.f32.mrb[1].mxu0 }
 0x187   :  { %v274_v58 = vmul.f32 -1.442695, %v157_v56 }
 0x189   :  { %420 = vpow2.f32 %v274_v58 }
 0x193   :  { %v421_v59 = vpop.eup %420 }
 0x194   :  { %v163_v60 = vadd.f32 1.0, %v421_v59 }
 0x196   :  { %422 = vrcp.f32 %v163_v60 }
 0x1a0   :  { %v423_v61 = vpop.eup %422 }
 0x1a1   :  { %365 = vmatmul.mubr.f32.vlgmr.msra.gmra.mrb[0].mxu1 %v423_v61 }
 0x274   :  { %v252_v0 = vpop.f32.mrb[0].mxu1 }
 0x275   :  { %v253_v1 = vadd.f32 %v252_v0, %v185_v63  ;;  %v366_v2 = vpop.f32.mrb[1].mxu1 }
 0x277   :  { %256 = vst [vmem:[#allocation8] sm:$0xff] %v253_v1 }
 0x278   :  { %501 = shalt.err (!%p498_p0)
}
 0x279   :  { %s502_s6 = scalar_lea.hbm %s629_s4, 128 }
 0x27a   :  { %p503_p1 = scmp.ne.s32.totalorder %s629_s4, %s502_s6  ;;  %p506_p2 = scmp.lt.u32.totalorder %s502_s6, %s629_s4 }
 0x27c   :  { %p508_p3 = pnand %p506_p2, %p503_p1 }
 0x27e   :  { %511 = shalt.err (!%p508_p3)
}
 0x27f   :  { %266 = dma.vmem_to_hbm [thread:$0]  %s264_s29, 128, %s629_s4, [#allocation4]  }
 0x280   :  { %516 = dma.done.wait [#allocation4], 128  }
 0x281   :  { %517 = vsyncadd [#allocation4], 4294967168 }
 0x282   :  { %270 = vsyncpa [#allocation3], 1 }
 0x283   :  { %271 = vsyncpa [#allocation6], 1 }
 0x284   :  { %272 = vsyncpa [#allocation4], 1 }

</bundles_post_ra>
